<compile_context>
chip_gen: v7x
topology: tpu7x:2x2x1
jax: 0.10.0
libtpu: 0.0.40
codegen_flags: <defaults>
</compile_context>

<pallas_src>
import functools

import jax
import jax.numpy as jnp
from jax.experimental import pallas as pl
from jax.experimental.pallas import tpu as pltpu  # noqa: F401  (TPU-specific extensions; see TODO below)

LANE = 128                      # TPU lane width
MXU_DTYPE = jnp.bfloat16        # native MXU dtype on v5e / v6e / v7x


def dueling_q_kernel(x_ref, w1_ref, b1_ref, wh_ref, bh_ref, out_ref, *,
                     out_size, inv_batch):
    # fc1 + ReLU: bf16 MXU matmul with f32 accumulation; bias-add / ReLU on the
    # VPU in f32 (v5e has no bf16 VPU).
    h = jnp.dot(x_ref[...], w1_ref[...], preferred_element_type=jnp.float32)
    h = jnp.maximum(h + b1_ref[...], 0.0)

    # Fused heads in ONE lane-dense (H, 128) matmul:
    #   columns [0:O]  = wa + wv   (advantage with the value head folded in)
    #   column  [O]    = wv        (pure value column, recovers mean(val))
    #   columns [O+1:] = 0         (padding -> unmasked lane-dense store)
    y = jnp.dot(h.astype(wh_ref.dtype), wh_ref[...],
                preferred_element_type=jnp.float32) + bh_ref[...]

    # Per-column mean over the BATCH dim (dim=0 in the PyTorch code);
    # 1/B is baked in at trace time, so there is no divide in the kernel.
    col_mean = jnp.sum(y, axis=0, keepdims=True) * inv_batch      # (1, LANE)

    # For j < O:  y[:, j]      = adv_j + val
    #             col_mean[j]  = mean(adv_j) + mean(val)
    #             col_mean[O]  = mean(val)
    # => out_j = y_j - col_mean_j + col_mean[O]
    # (only a (1,1) scalar and a (1,LANE) row broadcast -- no per-row lane
    #  broadcast of val as in the previous version).
    out = y - col_mean + col_mean[:, out_size:out_size + 1]
    out_ref[...] = out.astype(out_ref.dtype)


def prepare_params(w1, b1, wa, ba, wv, bv, mxu_dtype=MXU_DTYPE):
    """Build kernel-ready parameters ONCE (at parameter-load time).

    Weights are pre-transposed as (in_features, out_features); biases (1, out).
    Returns bf16 matmul weights and f32 biases, with the advantage + value heads
    fused (and value folded into the advantage columns) into a single lane-dense
    (H, 128) weight / (1, 128) bias.
    """
    H, O = wa.shape
    assert O + 1 <= LANE, "fused head assumes output_size + 1 <= 128"

    wh = jnp.zeros((H, LANE), jnp.float32)
    wh = wh.at[:, :O].set(wa + wv)          # value folded into advantage columns
    wh = wh.at[:, O:O + 1].set(wv)          # pure value column
    bh = jnp.zeros((1, LANE), jnp.float32)
    bh = bh.at[:, :O].set(ba + bv)
    bh = bh.at[:, O:O + 1].set(bv)

    return {
        "w1": jnp.asarray(w1, mxu_dtype),
        "b1": jnp.asarray(b1, jnp.float32).reshape(1, -1),
        "wh": wh.astype(mxu_dtype),
        "bh": bh,
        "out_size": O,                       # python int (static)
    }


def dueling_q_forward(x, params, *, return_padded=False):
    """x: (B, input_size) float32 (or bf16). params: output of prepare_params()."""
    w1, b1, wh, bh = params["w1"], params["b1"], params["wh"], params["bh"]
    out_size = params["out_size"]
    B, I = x.shape
    H = w1.shape[1]

    # Cast activations to the MXU dtype in the wrapper: halves the x DMA bytes;
    # accumulation inside the kernel stays f32.
    x = x.astype(w1.dtype)

    full = lambda a: pl.BlockSpec(a.shape, lambda: (0,) * a.ndim)

    flops = 2 * B * I * H + 2 * B * H * LANE + 6 * B * LANE
    bytes_accessed = (x.size * x.dtype.itemsize
                      + w1.size * w1.dtype.itemsize
                      + b1.size * 4
                      + wh.size * wh.dtype.itemsize
                      + bh.size * 4
                      + B * LANE * 4)

    # NOTE: advantage.mean(dim=0) couples all batch rows, so this kernel runs as
    # a single block over B.  We do not pad B up to a multiple of 8 here: padded
    # rows would corrupt the batch mean unless masked, and at small B the extra
    # pad ops outweigh the sublane-utilization gain.
    # TODO(synk): for large B (especially v7x: 64 MiB VMEM, 2 TensorCores) switch
    # to a batch-tiled two-pass grid ('arbitrary' reduction axis): pass 1
    # accumulates per-column sums into a pltpu.VMEM((1, LANE), f32) scratch with
    # pl.when init/finalize, pass 2 recomputes y and applies the subtraction,
    # with constant-index weight BlockSpecs so w1/wh are DMA'd once, and set
    # pltpu.CompilerParams(vmem_limit_bytes=...) from the tile sizes.
    out_padded = pl.pallas_call(
        functools.partial(dueling_q_kernel, out_size=out_size, inv_batch=1.0 / B),
        out_shape=jax.ShapeDtypeStruct((B, LANE), jnp.float32),
        grid=(),
        in_specs=[full(x), full(w1), full(b1), full(wh), full(bh)],
        out_specs=pl.BlockSpec((B, LANE), lambda: (0, 0)),
        cost_estimate=pl.CostEstimate(
            flops=flops, transcendentals=0, bytes_accessed=bytes_accessed),
    )(x, w1, b1, wh, bh)

    if return_padded:
        return out_padded            # (B, 128): columns [0:O] valid, rest padding
    return out_padded[:, :out_size]


def reference_forward(x, w1, b1, wa, ba, wv, bv):
    """Pure-JAX f32 reference matching the PyTorch module exactly."""
    h = jnp.maximum(x @ w1 + b1, 0.0)
    adv = h @ wa + ba
    val = h @ wv + bv
    return val + adv - jnp.mean(adv, axis=0, keepdims=True)


def reference_forward_quantized(x, params):
    """Same math as the kernel (bf16 MXU inputs, f32 accumulation) in plain JAX."""
    w1, b1, wh, bh, O = (params["w1"], params["b1"], params["wh"],
                         params["bh"], params["out_size"])
    h = jnp.dot(x.astype(w1.dtype), w1, preferred_element_type=jnp.float32)
    h = jnp.maximum(h + b1, 0.0)
    y = jnp.dot(h.astype(wh.dtype), wh, preferred_element_type=jnp.float32) + bh
    col_mean = jnp.mean(y, axis=0, keepdims=True)
    out = y - col_mean + col_mean[:, O:O + 1]
    return out[:, :O]


if __name__ == "__main__":
    # Small shapes consistent with the nn.Linear sizes in the module __init__.
    batch = 2
    input_size = 16
    hidden_size = 32
    output_size = 4

    key = jax.random.PRNGKey(0)
    kx, k1, k2, k3, k4, k5, k6 = jax.random.split(key, 7)

    x = jax.random.normal(kx, (batch, input_size), dtype=jnp.float32)

    # Deterministic "PyTorch-style" uniform init: U(-1/sqrt(fan_in), 1/sqrt(fan_in)).
    def init(k, shape, fan_in):
        bound = 1.0 / jnp.sqrt(jnp.float32(fan_in))
        return jax.random.uniform(k, shape, jnp.float32, -bound, bound)

    # Stored pre-transposed as (in_features, out_features); biases as (1, out).
    w1 = init(k1, (input_size, hidden_size), input_size)
    b1 = init(k2, (1, hidden_size), input_size)
    wa = init(k3, (hidden_size, output_size), hidden_size)
    ba = init(k4, (1, output_size), hidden_size)
    wv = init(k5, (hidden_size, 1), hidden_size)
    bv = init(k6, (1, 1), hidden_size)

    # Fused/padded head weights built ONCE, outside the per-call forward path.
    params = prepare_params(w1, b1, wa, ba, wv, bv)

    fwd = jax.jit(lambda xx: dueling_q_forward(xx, params))
    out = jax.block_until_ready(fwd(x))

    assert out.shape == (batch, output_size)

    # Tight check vs. a pure-JAX implementation of the *same* bf16-input math.
    ref_q = reference_forward_quantized(x, params)
    assert jnp.allclose(out, ref_q, atol=1e-3, rtol=1e-3), \
        "mismatch vs quantized (bf16-input) JAX reference"

    # Looser check vs. the full-f32 PyTorch-equivalent reference
    # (bf16 MXU inputs with f32 accumulation => ~1e-2 relative error budget).
    ref_f32 = reference_forward(x, w1, b1, wa, ba, wv, bv)
    assert jnp.allclose(out, ref_f32, atol=3e-2, rtol=3e-2), \
        "mismatch vs f32 reference beyond bf16 error budget"

    print("KERNEL_OK")
</pallas_src>

<mosaic_0001>
module attributes {stable_mosaic.version = 11 : i64} {
  func.func @dueling_q_kernel(%arg0: memref<2x16xbf16, #tpu.memory_space<vmem>>, %arg1: memref<16x32xbf16, #tpu.memory_space<vmem>>, %arg2: memref<1x32xf32, #tpu.memory_space<vmem>>, %arg3: memref<32x128xbf16, #tpu.memory_space<vmem>>, %arg4: memref<1x128xf32, #tpu.memory_space<vmem>>, %arg5: memref<2x128xf32, #tpu.memory_space<vmem>>) attributes {dimension_semantics = [], scalar_prefetch = 0 : i64, scratch_operands = 0 : i64, tpu.core_type = #tpu.core_type<tc>} {
    %c0 = arith.constant 0 : index
    %c0_0 = arith.constant 0 : index
    %0 = vector.load %arg0[%c0, %c0_0] : memref<2x16xbf16, #tpu.memory_space<vmem>>, vector<2x16xbf16>
    %c0_1 = arith.constant 0 : index
    %c0_2 = arith.constant 0 : index
    %1 = vector.load %arg1[%c0_1, %c0_2] : memref<16x32xbf16, #tpu.memory_space<vmem>>, vector<16x32xbf16>
    %cst = arith.constant dense<0.000000e+00> : vector<2x32xf32>
    %2 = tpu.matmul %0, %1, %cst {dimension_numbers = #tpu.dot_dimension_numbers<[1], [0], [0], [1], [0, 0, 1, 1], [], []>} : vector<2x16xbf16>, vector<16x32xbf16>, vector<2x32xf32> -> vector<2x32xf32>
    %c0_3 = arith.constant 0 : index
    %c0_4 = arith.constant 0 : index
    %3 = vector.load %arg2[%c0_3, %c0_4] : memref<1x32xf32, #tpu.memory_space<vmem>>, vector<1x32xf32>
    %4 = vector.broadcast %3 : vector<1x32xf32> to vector<2x32xf32>
    %5 = arith.addf %2, %4 : vector<2x32xf32>
    %cst_5 = arith.constant 0.000000e+00 : f32
    %6 = vector.broadcast %cst_5 : f32 to vector<2x32xf32>
    %7 = arith.maximumf %5, %6 : vector<2x32xf32>
    %8 = arith.truncf %7 : vector<2x32xf32> to vector<2x32xbf16>
    %c0_6 = arith.constant 0 : index
    %c0_7 = arith.constant 0 : index
    %9 = vector.load %arg3[%c0_6, %c0_7] : memref<32x128xbf16, #tpu.memory_space<vmem>>, vector<32x128xbf16>
    %cst_8 = arith.constant dense<0.000000e+00> : vector<2x128xf32>
    %10 = tpu.matmul %8, %9, %cst_8 {dimension_numbers = #tpu.dot_dimension_numbers<[1], [0], [0], [1], [0, 0, 1, 1], [], []>} : vector<2x32xbf16>, vector<32x128xbf16>, vector<2x128xf32> -> vector<2x128xf32>
    %c0_9 = arith.constant 0 : index
    %c0_10 = arith.constant 0 : index
    %11 = vector.load %arg4[%c0_9, %c0_10] : memref<1x128xf32, #tpu.memory_space<vmem>>, vector<1x128xf32>
    %12 = vector.broadcast %11 : vector<1x128xf32> to vector<2x128xf32>
    %13 = arith.addf %10, %12 : vector<2x128xf32>
    %cst_11 = arith.constant dense<0.000000e+00> : vector<128xf32>
    %14 = vector.multi_reduction <add>, %13, %cst_11 [0] : vector<2x128xf32> to vector<128xf32>
    %15 = vector.shape_cast %14 : vector<128xf32> to vector<1x128xf32>
    %cst_12 = arith.constant 5.000000e-01 : f32
    %16 = vector.broadcast %cst_12 : f32 to vector<1x128xf32>
    %17 = arith.mulf %15, %16 : vector<1x128xf32>
    %18 = vector.broadcast %17 : vector<1x128xf32> to vector<2x128xf32>
    %19 = arith.subf %13, %18 : vector<2x128xf32>
    %20 = vector.extract_strided_slice %17 {offsets = [0, 4], sizes = [1, 1], strides = [1, 1]} : vector<1x128xf32> to vector<1x1xf32>
    %21 = vector.broadcast %20 : vector<1x1xf32> to vector<2x128xf32>
    %22 = arith.addf %19, %21 : vector<2x128xf32>
    %c0_13 = arith.constant 0 : index
    %c0_14 = arith.constant 0 : index
    %23 = vector.load %arg5[%c0_13, %c0_14] : memref<2x128xf32, #tpu.memory_space<vmem>>, vector<2x128xf32>
    tpu.vector_store %arg5[%c0_13, %c0_14], %22 {strides = array<i32>} : memref<2x128xf32, #tpu.memory_space<vmem>>, vector<2x128xf32>,
    return
  }
}

</mosaic_0001>

<bundles_post_ra>
// kernel: _lambda_.1
= control target key start
LH: loop header
LB: loop body
LE: loop exit
PB: predicated region body
PF: predicated region fallthrough
CT: control target
= control target key end

     0   :  { %v240_v1 = vmov 0.0   ;;  %vm38_vm0 = vcmask 130048   ;;  %vm241_vm1 = vmmov 0   ;;  %s304_s0 = inlined_call_operand.vmem [shape: bf16[2,16], index: 0, kind: input, shape index: {}]   ;;  %s305_s1 = inlined_call_operand.vmem [shape: bf16[16,32], index: 1, kind: input, shape index: {}]   ;;  %s306_s2 = inlined_call_operand.vmem [shape: f32[1,32], index: 2, kind: input, shape index: {}]   ;;  %s307_s3 = inlined_call_operand.vmem [shape: bf16[32,128], index: 3, kind: input, shape index: {}]   ;;  %s308_s4 = inlined_call_operand.vmem [shape: f32[1,128], index: 4, kind: input, shape index: {}]   ;;  %s309_s5 = inlined_call_operand.hbm [shape: f32[2,128], index: 5, kind: output, shape index: {}]  }
   0x1   :  { %v213_v0 = vld [vmem:[%s305_s1] sm:$0xff]   ;;  %194 = vmatprep.subr.bf16.mxu0 %v240_v1  ;;  %200 = vmatprep.subr.bf16.mxu1 %v240_v1 }
   0x2   :  { %v22_v2 = vld [vmem:[%s304_s0] sm:$0x1]  ;;  %195 = vmatpush3.bf16.msra.mxu0 %v213_v0  ;;  %196 = vmatprep.mubr.msk.bf16.mxu0 %vm241_vm1, %v240_v1 }
   0x3   :  { %204 = vmatprep.mubr.msk.bf16.mxu1 %vm241_vm1, %v240_v1 }
   0x4   :  { %10 = vsyncpa [#allocation3], 0  ;;  %v214_v3 = vld [vmem:[%s307_s3] sm:$0xff]   ;;  %v215_v4 = vld [vmem:[%s307_s3 + $0x8] sm:$0xff]   ;;  %vm107_vm2 = vcmask 261120   ;;  %v242_v13 = vmov 4  }
   0x5   :  { %197 = vmatmul.mubr.msk.bf16.vlgmr.msra.gmra.mrb[0].mxu0 %vm38_vm0, %v22_v2  ;;  %201 = vmatpush3.bf16.msra.mxu1 %v214_v3  ;;  %v182_v5 = vld [vmem:[%s306_s2] ss:$0 sm:$0xff]  ;;  %vm151_vm3 = vcmask 1041408   ;;  %s243_s2 = smov [#allocation2]  }
   0x6   :  { %202 = vmatprep.subr.bf16.mxu1 %v240_v1  ;;  %212 = vset.pattern.permute.xlu0 %v242_v13  ;;  %v185_v14 = vld [vmem:[%s308_s4] ss:$0 sm:$0xff]  ;;  %s174_s3 = sshll.u32 %s243_s2, 4  ;;  %s175_s3 = int_to_ptr.vmem [resolvable:$true] %s174_s3 }
   0x7   :  { %s216_s4 = scalar_lea.vmem %s175_s3, 32  ;;  %p221_p1 = scmp.lt.s32.totalorder %s175_s3, %s175_s3 }
   0x8   :  { %p217_p0 = scmp.ne.s32.totalorder %s175_s3, %s216_s4  ;;  %p222_p2 = scmp.lt.s32.totalorder %s216_s4, %s216_s4 }
   0x9   :  { %203 = vmatpush3.bf16.msra.mxu1 %v215_v4 }
   0xa   :  { %p223_p3 = por %p222_p2, %p221_p1 }
   0xc   :  { %p224_p4 = pnand %p223_p3, %p217_p0 }
  0xd8   :  { %v76_v6 = vpop.f32.mrb[0].mxu0 }
  0xd9   :  { %v77_v7 = vadd.f32 %v182_v5, %v76_v6  ;;  %v198_v8 = vpop.f32.mrb[1].mxu0 }
  0xda   :  { %v79_v9 = vpop.f32.mrb[2].mxu0 }
  0xdb   :  { %v82_v10 = vmax.f32 %v77_v7, 0.0  ;;  %v199_v11 = vpop.f32.mrb[3].mxu0 }
  0xdd   :  { %v83_v12 = vpack.c.bf16 %v82_v10, %v82_v10 }
  0xdf   :  { %205 = vmatmul.mubr.msk.bf16.vlgmr.msra.gmra.mrb[0].mxu1 %vm107_vm2, %v83_v12 }
 0x1b2   :  { %v145_v15 = vpop.f32.mrb[0].mxu1 }
 0x1b3   :  { %v146_v16 = vadd.f32 %v185_v14, %v145_v15  ;;  %v206_v17 = vpop.f32.mrb[1].mxu1 }
 0x1b4   :  { %v148_v18 = vpop.f32.mrb[2].mxu1 }
 0x1b5   :  { %v152_v19 = vsel %vm151_vm3, %v146_v16, 0.0  ;;  %v207_v20 = vpop.f32.mrb[3].mxu1 }
 0x1b6   :  { %v153_v21 = vrot.slane %v152_v19, 4 }
 0x1b8   :  { %v154_v22 = vadd.f32 %v153_v21, %v152_v19 }
 0x1ba   :  { %v155_v23 = vrot.slane %v154_v22, 2 }
 0x1bc   :  { %v156_v24 = vadd.f32 %v155_v23, %v154_v22 }
 0x1be   :  { %v157_v25 = vrot.slane %v156_v24, 1 }
 0x1c0   :  { %v158_v26 = vadd.f32 %v157_v25, %v156_v24 }
 0x1c2   :  { %v159_v27 = vmul.f32 0.5, %v158_v26 }
 0x1c4   :  { %163 = vperm.xlu0 %212, %v159_v27   ;;  %v160_v28 = vsub.f32 %v146_v16, %v159_v27 }
 0x243   :  { %v164_v29 = vpop.permute.xlu0 %163 }
 0x244   :  { %v166_v30 = vadd.f32 %v164_v29, %v160_v28 }
 0x246   :  { %167 = vst [vmem:[#allocation2] sm:$0x3] %v166_v30 }
 0x247   :  { %227 = shalt.err (!%p224_p4)
}
 0x248   :  { %s228_s30 = scalar_lea.hbm %s309_s5, 32 }
 0x249   :  { %p229_p5 = scmp.ne.s32.totalorder %s309_s5, %s228_s30  ;;  %p232_p6 = scmp.lt.u32.totalorder %s228_s30, %s309_s5 }
 0x24b   :  { %p234_p7 = pnand %p232_p6, %p229_p5 }
 0x24d   :  { %237 = shalt.err (!%p234_p7)
}
 0x24e   :  { %177 = dma.vmem_to_hbm [thread:$0]  %s175_s3, 32, %s309_s5, [#allocation3]  }
 0x24f   :  { %238 = dma.done.wait [#allocation3], 32  }
 0x250   :  { %239 = vsyncadd [#allocation3], 4294967264 }
 0x251   :  { %181 = vsyncpa [#allocation3], 1 }

</bundles_post_ra>
